<compile_context>
chip_gen: v7x
topology: tpu7x:2x2x1
jax: 0.10.0
libtpu: 0.0.40
codegen_flags: <defaults>
</compile_context>

<pallas_src>
import functools

import jax
import jax.numpy as jnp
from jax.experimental import pallas as pl
from jax.experimental.pallas import tpu as pltpu


def _round_up(x, m):
    return ((x + m - 1) // m) * m


def _pick_tiles(bs, c, hw, itemsize, budget_bytes=2 * 1024 * 1024):
    """Pick (TB, TS): lane-aligned spatial tile and a legal batch tile."""
    ts = min(_round_up(hw, 128), 2048)
    # Batch-tile candidates must satisfy the sublane constraint on the output
    # block: multiple of 8, or equal to the full batch dim; and divide bs.
    tb_cands = sorted(
        {tb for tb in (8, 16, 32, bs)
         if tb <= bs and bs % tb == 0 and (tb % 8 == 0 or tb == bs)},
        reverse=True,
    )
    while True:
        for tb in tb_cands:
            if tb * c * ts * itemsize <= budget_bytes:
                return tb, ts
        if ts > 128:
            ts = max(128, ts // 2)
        else:
            return tb_cands[-1], ts


def _se_block_kernel(x_ref, w1_ref, w2_ref, o_ref, acc_ref, *, hw, ts):
    """Grid = (batch_tiles, spatial_tiles); spatial (reduction) axis is last."""
    k = pl.program_id(1)

    # ---- init f32 accumulator at the first spatial step of each batch tile ----
    @pl.when(k == 0)
    def _():
        acc_ref[...] = jnp.zeros_like(acc_ref)

    # ---- streaming partial sum over this spatial tile (accumulate in f32) ----
    x = x_ref[...]                                            # (TB, c, TS), input dtype
    if hw % ts != 0:
        # Last tile extends past h*w: mask the out-of-range lanes to zero.
        lane = jax.lax.broadcasted_iota(jnp.int32, x.shape, dimension=2)
        valid = (k * ts + lane) < hw
        x = jnp.where(valid, x, jnp.zeros_like(x))
    acc_ref[...] += jnp.sum(x, axis=-1, dtype=jnp.float32)     # (TB, c)

    # ---- finalize once per batch tile: mean + excitation ----
    @pl.when(k == pl.num_programs(1) - 1)
    def _():
        y = acc_ref[...] * jnp.float32(1.0 / hw)               # global average pool
        w1 = w1_ref[...].astype(jnp.float32)                   # (c, c), PyTorch (out, in)
        w2 = w2_ref[...].astype(jnp.float32)
        # y @ W.T without an in-kernel transpose: contract dim 1 with dim 1.
        y = jax.lax.dot_general(y, w1, (((1,), (1,)), ((), ())),
                                preferred_element_type=jnp.float32)
        y = jnp.maximum(y, 0.0)
        y = jax.lax.dot_general(y, w2, (((1,), (1,)), ((), ())),
                                preferred_element_type=jnp.float32)
        y = jax.nn.sigmoid(y)
        o_ref[...] = y.astype(o_ref.dtype)


def se_block_forward(x, w1, w2):
    """x: (bs, c, h, w) NCHW. Returns (bs, c, 1, 1), matching the PyTorch module."""
    bs, c, h, w = x.shape
    hw = h * w
    x_flat = x.reshape(bs, c, hw)

    itemsize = jnp.dtype(x.dtype).itemsize
    tb, ts = _pick_tiles(bs, c, hw, itemsize)
    n_batch_tiles = bs // tb
    n_spatial_tiles = pl.cdiv(hw, ts)

    kernel = functools.partial(_se_block_kernel, hw=hw, ts=ts)

    cost = pl.CostEstimate(
        flops=bs * c * hw + 4 * bs * c * c,
        transcendentals=bs * c,
        bytes_accessed=bs * c * hw * itemsize
        + 2 * c * c * jnp.dtype(w1.dtype).itemsize
        + bs * c * itemsize,
    )

    out = pl.pallas_call(
        kernel,
        out_shape=jax.ShapeDtypeStruct((bs, c), x.dtype),
        grid=(n_batch_tiles, n_spatial_tiles),
        in_specs=[
            pl.BlockSpec((tb, c, ts), lambda b, k: (b, 0, k)),   # streamed input
            pl.BlockSpec((c, c), lambda b, k: (0, 0)),           # resident weight 1
            pl.BlockSpec((c, c), lambda b, k: (0, 0)),           # resident weight 2
        ],
        out_specs=pl.BlockSpec((tb, c), lambda b, k: (b, 0)),
        scratch_shapes=[pltpu.VMEM((tb, c), jnp.float32)],
        compiler_params=pltpu.CompilerParams(
            dimension_semantics=("parallel", "arbitrary"),
            vmem_limit_bytes=32 * 1024 * 1024,
        ),
        cost_estimate=cost,
    )(x_flat, w1, w2)

    return out.reshape(bs, c, 1, 1)


if __name__ == "__main__":
    bs, c, h, w = 2, 4, 16, 16

    key = jax.random.PRNGKey(0)
    kx, k1, k2 = jax.random.split(key, 3)

    x = jax.random.normal(kx, (bs, c, h, w), dtype=jnp.float32)
    # nn.Linear(c, c, bias=False) weights: (out_features, in_features) = (c, c)
    w1 = jax.random.normal(k1, (c, c), dtype=jnp.float32) * (1.0 / jnp.sqrt(c))
    w2 = jax.random.normal(k2, (c, c), dtype=jnp.float32) * (1.0 / jnp.sqrt(c))

    y = se_block_forward(x, w1, w2)
    jax.block_until_ready(y)

    # Pure-JAX reference of the same math.
    y_ref = jnp.mean(x, axis=(2, 3))
    y_ref = jnp.maximum(y_ref @ w1.T, 0.0)
    y_ref = jax.nn.sigmoid(y_ref @ w2.T).reshape(bs, c, 1, 1)

    assert y.shape == (bs, c, 1, 1)
    assert jnp.allclose(y, y_ref, atol=1e-5, rtol=1e-5)

    print("KERNEL_OK")
</pallas_src>

<mosaic_0001>
module attributes {stable_mosaic.version = 11 : i64} {
  func.func @_se_block_kernel(%arg0: i32, %arg1: i32, %arg2: memref<2x4x256xf32, #tpu.memory_space<vmem>>, %arg3: memref<4x4xf32, #tpu.memory_space<vmem>>, %arg4: memref<4x4xf32, #tpu.memory_space<vmem>>, %arg5: memref<2x4xf32, #tpu.memory_space<vmem>>, %arg6: memref<2x4xf32, #tpu.memory_space<vmem>>) attributes {dimension_semantics = [#tpu.dimension_semantics<parallel>, #tpu.dimension_semantics<arbitrary>], iteration_bounds = array<i64: 1, 1>, scalar_prefetch = 0 : i64, scratch_operands = 1 : i64, tpu.core_type = #tpu.core_type<tc>, window_params = [{transform_indices = @transform_0, window_bounds = array<i64: 2, 4, 256>}, {pipeline_mode = #tpu.pipeline_mode<synchronous>, transform_indices = @transform_1, window_bounds = array<i64: 4, 4>}, {pipeline_mode = #tpu.pipeline_mode<synchronous>, transform_indices = @transform_2, window_bounds = array<i64: 4, 4>}, {transform_indices = @transform_3, window_bounds = array<i64: 2, 4>}]} {
    %c0_i32 = arith.constant 0 : i32
    %0 = arith.cmpi eq, %arg1, %c0_i32 : i32
    %1 = arith.extui %0 : i1 to i32
    %c0_i32_0 = arith.constant 0 : i32
    %2 = arith.cmpi ne, %1, %c0_i32_0 : i32
    scf.if %2 {
      %cst_9 = arith.constant 0.000000e+00 : f32
      %11 = vector.broadcast %cst_9 : f32 to vector<2x4xf32>
      %c0_10 = arith.constant 0 : index
      %c0_11 = arith.constant 0 : index
      %12 = vector.load %arg6[%c0_10, %c0_11] : memref<2x4xf32, #tpu.memory_space<vmem>>, vector<2x4xf32>
      tpu.vector_store %arg6[%c0_10, %c0_11], %11 {strides = array<i32>} : memref<2x4xf32, #tpu.memory_space<vmem>>, vector<2x4xf32>,
    } else {
    }
    %c0 = arith.constant 0 : index
    %c0_1 = arith.constant 0 : index
    %c0_2 = arith.constant 0 : index
    %3 = vector.load %arg2[%c0, %c0_1, %c0_2] : memref<2x4x256xf32, #tpu.memory_space<vmem>>, vector<2x4x256xf32>
    %c0_3 = arith.constant 0 : index
    %c0_4 = arith.constant 0 : index
    %4 = vector.load %arg6[%c0_3, %c0_4] : memref<2x4xf32, #tpu.memory_space<vmem>>, vector<2x4xf32>
    %cst = arith.constant dense<0.000000e+00> : vector<2x4xf32>
    %5 = vector.multi_reduction <add>, %3, %cst [2] : vector<2x4x256xf32> to vector<2x4xf32>
    %6 = arith.addf %4, %5 : vector<2x4xf32>
    %c0_5 = arith.constant 0 : index
    %c0_6 = arith.constant 0 : index
    %7 = vector.load %arg6[%c0_5, %c0_6] : memref<2x4xf32, #tpu.memory_space<vmem>>, vector<2x4xf32>
    tpu.vector_store %arg6[%c0_5, %c0_6], %6 {strides = array<i32>} : memref<2x4xf32, #tpu.memory_space<vmem>>, vector<2x4xf32>,
    %c0_i32_7 = arith.constant 0 : i32
    %8 = arith.cmpi eq, %arg1, %c0_i32_7 : i32
    %9 = arith.extui %8 : i1 to i32
    %c0_i32_8 = arith.constant 0 : i32
    %10 = arith.cmpi ne, %9, %c0_i32_8 : i32
    scf.if %10 {
      %c0_9 = arith.constant 0 : index
      %c0_10 = arith.constant 0 : index
      %11 = vector.load %arg6[%c0_9, %c0_10] : memref<2x4xf32, #tpu.memory_space<vmem>>, vector<2x4xf32>
      %cst_11 = arith.constant 3.906250e-03 : f32
      %12 = vector.broadcast %cst_11 : f32 to vector<2x4xf32>
      %13 = arith.mulf %11, %12 : vector<2x4xf32>
      %c0_12 = arith.constant 0 : index
      %c0_13 = arith.constant 0 : index
      %14 = vector.load %arg3[%c0_12, %c0_13] : memref<4x4xf32, #tpu.memory_space<vmem>>, vector<4x4xf32>
      %c0_14 = arith.constant 0 : index
      %c0_15 = arith.constant 0 : index
      %15 = vector.load %arg4[%c0_14, %c0_15] : memref<4x4xf32, #tpu.memory_space<vmem>>, vector<4x4xf32>
      %cst_16 = arith.constant dense<0.000000e+00> : vector<2x4xf32>
      %16 = tpu.matmul %13, %14, %cst_16 {dimension_numbers = #tpu.dot_dimension_numbers<[1], [1], [0], [0], [0, 0, 1, 0], [], []>} : vector<2x4xf32>, vector<4x4xf32>, vector<2x4xf32> -> vector<2x4xf32>
      %cst_17 = arith.constant 0.000000e+00 : f32
      %17 = vector.broadcast %cst_17 : f32 to vector<2x4xf32>
      %18 = arith.maximumf %16, %17 : vector<2x4xf32>
      %cst_18 = arith.constant dense<0.000000e+00> : vector<2x4xf32>
      %19 = tpu.matmul %18, %15, %cst_18 {dimension_numbers = #tpu.dot_dimension_numbers<[1], [1], [0], [0], [0, 0, 1, 0], [], []>} : vector<2x4xf32>, vector<4x4xf32>, vector<2x4xf32> -> vector<2x4xf32>
      %20 = arith.negf %19 : vector<2x4xf32>
      %21 = math.exp %20 : vector<2x4xf32>
      %cst_19 = arith.constant 1.000000e+00 : f32
      %22 = vector.broadcast %cst_19 : f32 to vector<2x4xf32>
      %23 = arith.addf %22, %21 : vector<2x4xf32>
      %24 = arith.divf %22, %23 : vector<2x4xf32>
      %c0_20 = arith.constant 0 : index
      %c0_21 = arith.constant 0 : index
      %25 = vector.load %arg5[%c0_20, %c0_21] : memref<2x4xf32, #tpu.memory_space<vmem>>, vector<2x4xf32>
      tpu.vector_store %arg5[%c0_20, %c0_21], %24 {strides = array<i32>} : memref<2x4xf32, #tpu.memory_space<vmem>>, vector<2x4xf32>,
    } else {
    }
    return
  }
  func.func @transform_0(%arg0: i32, %arg1: i32) -> (i32, i32, i32) {
    %c0_i32 = arith.constant 0 : i32
    %c0_i32_0 = arith.constant 0 : i32
    return %arg0, %c0_i32, %arg1 : i32, i32, i32
  }
  func.func @transform_1(%arg0: i32, %arg1: i32) -> (i32, i32) {
    %c0_i32 = arith.constant 0 : i32
    %c0_i32_0 = arith.constant 0 : i32
    %c0_i32_1 = arith.constant 0 : i32
    return %c0_i32, %c0_i32_0 : i32, i32
  }
  func.func @transform_2(%arg0: i32, %arg1: i32) -> (i32, i32) {
    %c0_i32 = arith.constant 0 : i32
    %c0_i32_0 = arith.constant 0 : i32
    %c0_i32_1 = arith.constant 0 : i32
    return %c0_i32, %c0_i32_0 : i32, i32
  }
  func.func @transform_3(%arg0: i32, %arg1: i32) -> (i32, i32) {
    %c0_i32 = arith.constant 0 : i32
    %c0_i32_0 = arith.constant 0 : i32
    return %arg0, %c0_i32 : i32, i32
  }
}

</mosaic_0001>

<bundles_post_ra>
// kernel: tpu_custom_call.1
= control target key start
LH: loop header
LB: loop body
LE: loop exit
PB: predicated region body
PF: predicated region fallthrough
CT: control target
= control target key end

     0   :  { %8 = vsyncpa [#allocation4], 0  ;;  %s446_s0 = inlined_call_operand.hbm [shape: f32[2,4,256], index: 0, kind: input, shape index: {}]   ;;  %s447_s1 = inlined_call_operand.hbm [shape: f32[4,4], index: 1, kind: input, shape index: {}]   ;;  %s448_s2 = inlined_call_operand.vmem [shape: f32[4,4], index: 2, kind: input, shape index: {}]   ;;  %s449_s3 = inlined_call_operand.hbm [shape: f32[2,4], index: 3, kind: output, shape index: {}]  }
   0x1   :  { %9 = vsyncpa [#allocation7], 0 }
   0x2   :  { %10 = vsyncpa [#allocation5], 0  ;;  %s373_s12 = smov [#allocation3]   ;;  %s301_s16 = scalar_lea.hbm %s446_s0, 256 }
   0x3   :  { %s16_s13 = sshll.u32 %s373_s12, 4  ;;  %p302_p0 = scmp.ne.s32.totalorder %s446_s0, %s301_s16  ;;  %s17_s13 = int_to_ptr.vmem [resolvable:$true] %s16_s13 }
   0x4   :  { %p305_p1 = scmp.lt.u32.totalorder %s301_s16, %s446_s0 }
   0x6   :  { %p307_p2 = pnand %p305_p1, %p302_p0 }
   0x8   :  { %310 = shalt.err (!%p307_p2)
}
   0x9   :  { %s311_s21 = scalar_lea.vmem %s17_s13, 256  ;;  %p316_p4 = scmp.lt.s32.totalorder %s17_s13, %s17_s13 }
   0xa   :  { %p312_p3 = scmp.ne.s32.totalorder %s17_s13, %s311_s21  ;;  %p317_p5 = scmp.lt.s32.totalorder %s311_s21, %s311_s21 }
   0xc   :  { %p318_p6 = por %p317_p5, %p316_p4 }
   0xe   :  { %p319_p7 = pnand %p318_p6, %p312_p3 }
  0x10   :  { %322 = shalt.err (!%p319_p7)
}
  0x11   :  { %s374_s22 = smov 128   ;;  %s375_s23 = smov 8  }
  0x12   :  { %22 = dma.hbm_to_vmem [thread:$0]  %s446_s0, 256, %s17_s13, [#allocation4], %s374_s22, %s374_s22, %s375_s23  }
  0x13   :  { %s376_s26 = smov [#allocation6]   ;;  %s323_s30 = scalar_lea.hbm %s447_s1, 64 }
  0x14   :  { %s29_s27 = sshll.u32 %s376_s26, 4  ;;  %p324_p8 = scmp.ne.s32.totalorder %s447_s1, %s323_s30  ;;  %s30_s27 = int_to_ptr.vmem [resolvable:$true] %s29_s27 }
  0x15   :  { %p327_p9 = scmp.lt.u32.totalorder %s323_s30, %s447_s1 }
  0x17   :  { %p329_p10 = pnand %p327_p9, %p324_p8 }
  0x19   :  { %332 = shalt.err (!%p329_p10)
}
  0x1a   :  { %s333_s8 = scalar_lea.vmem %s30_s27, 64  ;;  %p338_p12 = scmp.lt.s32.totalorder %s30_s27, %s30_s27 }
  0x1b   :  { %p334_p11 = scmp.ne.s32.totalorder %s30_s27, %s333_s8  ;;  %p339_p13 = scmp.lt.s32.totalorder %s333_s8, %s333_s8 }
  0x1d   :  { %p340_p0 = por %p339_p13, %p338_p12 }
  0x1f   :  { %p341_p1 = pnand %p340_p0, %p334_p11 }
  0x21   :  { %344 = shalt.err (!%p341_p1)
}
  0x22   :  { %32 = dma.hbm_to_vmem [thread:$0]  %s447_s1, 64, %s30_s27, [#allocation7]  }
  0x23   :  { %367 = dma.done.wait [#allocation4], 256  }
  0x24   :  { %368 = vsyncadd [#allocation4], 4294967040 }
  0x25   :  { %369 = dma.done.wait [#allocation7], 64  }
  0x26   :  { %370 = vsyncadd [#allocation7], 4294967232  ;;  %vm56_vm0 = vcmask 1043456   ;;  %v47_v0 = vld [vmem:[#allocation3] sm:$0xff]  ;;  %v48_v1 = vld [vmem:[#allocation3 + $0x8] sm:$0xff]  ;;  %vm45_vm1 = vcmask 25600   ;;  %v69_v12 = vlaneseq }
  0x27   :  { %v52_v2 = vcombine.high %v47_v0, %v47_v0  ;;  %v57_v3 = vsel %vm56_vm0, %v47_v0, 0.0  ;;  %v53_v4 = vcombine.high %v48_v1, %v48_v1  ;;  %v62_v6 = vsel %vm56_vm0, %v48_v1, 0.0  ;;  %v90_v11 = vld [vmem:[#allocation6] sm:$0xf]  ;;  %v91_v25 = vld [vmem:[%s448_s2] sm:$0xf] }
  0x28   :  { %v377_v10 = vmov 0.0   ;;  %vm92_vm2 = vcmask 31744   ;;  %vm378_vm3 = vmmov 0   ;;  %v70_v13 = vand.u32 127, %v69_v12  ;;  %s379_s11 = smov [#allocation8]  }
  0x29   :  { %v58_v5 = vsel %vm56_vm0, %v52_v2, 0.0  ;;  %v63_v7 = vsel %vm56_vm0, %v53_v4, 0.0  ;;  %46 = vst.msk [vmem:[#allocation2] sm:$0x3] %vm45_vm1, %v377_v10  ;;  %278 = vmatprep.subr.mxu0 %v377_v10  ;;  %283 = vmatprep.subr.mxu1 %v377_v10  ;;  %v72_v14 = vshrl.u32 %v69_v12, 7  ;;  %vm79_vm4 = vcmask 1041409  }
  0x2a   :  { %v59_v8 = vadd.f32 %v58_v5, %v57_v3  ;;  %v64_v9 = vadd.f32 %v63_v7, %v62_v6  ;;  %279 = vmatpush3.xpose.msk.msra.mxu0 %vm92_vm2, %v90_v11  ;;  %280 = vmatprep.mubr.msk.f32.mxu0 %vm378_vm3, %v377_v10  ;;  %s259_s12 = sshll.u32 %s379_s11, 4  ;;  %s260_s12 = int_to_ptr.vmem [resolvable:$true] %s259_s12 }
  0x2b   :  { %285 = vmatprep.mubr.msk.f32.mxu1 %vm378_vm3, %v377_v10  ;;  %v73_v16 = vsub.s32 %v70_v13, %v72_v14  ;;  %284 = vmatpush3.xpose.msk.msra.mxu1 %vm92_vm2, %v91_v25  ;;  %s345_s2 = scalar_lea.vmem %s260_s12, 32  ;;  %p350_p3 = scmp.lt.s32.totalorder %s260_s12, %s260_s12 }
  0x2c   :  { %60 = vadd.xlane.f32.xlu0 %v59_v8  ;;  %p346_p2 = scmp.ne.s32.totalorder %s260_s12, %s345_s2  ;;  %p351_p4 = scmp.lt.s32.totalorder %s345_s2, %s345_s2 }
  0x2e   :  { %p352_p5 = por %p351_p4, %p350_p3 }
  0x30   :  { %65 = vadd.xlane.f32.xlu0 %v64_v9  ;;  %v49_v20 = vld [vmem:[#allocation2] sm:$0x3]  ;;  %p353_p6 = pnand %p352_p5, %p346_p2 }
  0xb9   :  { %v61_v15 = vpop.xlane.xlu0 %60 }
  0xba   :  { %v74_v18 = vrot.slane %v61_v15, %v73_v16 }
  0xbd   :  { %v66_v17 = vpop.xlane.xlu0 %65 }
  0xbe   :  { %v78_v19 = vrot.slane %v66_v17, %v73_v16 }
  0xc0   :  { %v80_v21 = vsel %vm79_vm4, %v78_v19, %v74_v18 }
  0xc1   :  { %v82_v22 = vadd.f32 %v80_v21, %v49_v20 }
  0xc3   :  { %84 = vst.msk [vmem:[#allocation2] sm:$0x3] %vm45_vm1, %v82_v22 }
  0xca   :  { %v88_v23 = vld [vmem:[#allocation2] sm:$0x3] }
  0xcb   :  { %v89_v24 = vmul.f32 0.00390625, %v88_v23 }
  0xcd   :  { %281 = vmatmul.mubr.msk.f32.vlgmr.msra.gmra.mrb[0].mxu0 %vm92_vm2, %v89_v24 }
 0x1a0   :  { %v165_v26 = vpop.f32.mrb[0].mxu0 }
 0x1a1   :  { %v169_v27 = vmax.f32 %v165_v26, 0.0  ;;  %v282_v28 = vpop.f32.mrb[1].mxu0 }
 0x1a3   :  { %286 = vmatmul.mubr.msk.f32.vlgmr.msra.gmra.mrb[0].mxu1 %vm92_vm2, %v169_v27 }
 0x276   :  { %v242_v29 = vpop.f32.mrb[0].mxu1 }
 0x277   :  { %v273_v30 = vmul.f32 -1.442695, %v242_v29  ;;  %v287_v31 = vpop.f32.mrb[1].mxu1 }
 0x279   :  { %297 = vpow2.f32 %v273_v30 }
 0x283   :  { %v298_v32 = vpop.eup %297 }
 0x284   :  { %v249_v33 = vadd.f32 1.0, %v298_v32 }
 0x286   :  { %299 = vrcp.f32 %v249_v33 }
 0x290   :  { %v300_v34 = vpop.eup %299 }
 0x291   :  { %252 = vst.msk [vmem:[#allocation8] sm:$0x3] %vm45_vm1, %v300_v34 }
 0x292   :  { %356 = shalt.err (!%p353_p6)
}
 0x293   :  { %s357_s15 = scalar_lea.hbm %s449_s3, 32 }
 0x294   :  { %p358_p7 = scmp.ne.s32.totalorder %s449_s3, %s357_s15  ;;  %p361_p8 = scmp.lt.u32.totalorder %s357_s15, %s449_s3 }
 0x296   :  { %p363_p9 = pnand %p361_p8, %p358_p7 }
 0x298   :  { %366 = shalt.err (!%p363_p9)
}
 0x299   :  { %262 = dma.vmem_to_hbm [thread:$0]  %s260_s12, 32, %s449_s3, [#allocation5]  }
 0x29a   :  { %371 = dma.done.wait [#allocation5], 32  }
 0x29b   :  { %372 = vsyncadd [#allocation5], 4294967264 }
 0x29c   :  { %266 = vsyncpa [#allocation4], 1 }
 0x29d   :  { %267 = vsyncpa [#allocation7], 1 }
 0x29e   :  { %268 = vsyncpa [#allocation5], 1 }

</bundles_post_ra>
